<compile_context>
chip_gen: v6e
topology: v6e:2x2x1
jax: 0.10.0
libtpu: 0.0.40
codegen_flags: <defaults>
</compile_context>

<pallas_src>
import functools

import jax
import jax.numpy as jnp
from jax import lax
from jax.experimental import pallas as pl
from jax.experimental.pallas import tpu as pltpu

_LANE = 128
_SUBLANE = 8


def _round_up(x, m):
    return ((x + m - 1) // m) * m


def _choose_batch_tiling(batch, tile_b):
    """Return (tb, batch_pad, n_steps).

    * batch <= 128: single grid step, pad only to a sublane multiple (8).
    * batch  > 128: >= 2 grid steps (so the "parallel" axis can shard across
      v7x's two TensorCores), tile a multiple of 128 (lane-dense transposed
      output store), and a small local search keeps padding waste low instead
      of the worst-case ~2x from round_up(batch, tb).
    """
    tile_b = max(_LANE, (tile_b // _LANE) * _LANE)
    if batch <= _LANE:
        tb = max(_SUBLANE, _round_up(batch, _SUBLANE))
        return tb, tb, 1
    b128 = _round_up(batch, _LANE)
    n_min = max(2, -(-b128 // tile_b))
    best = None
    for n in range(n_min, n_min + 8):
        tb = _round_up(-(-batch // n), _LANE)
        if tb > tile_b:
            continue
        pad = tb * n
        if best is None or pad < best[1]:
            best = (tb, pad, n)
    return best


def _mlp_kernel(n_hidden, x_ref, *refs):
    """refs = (w0, b0, ..., w_{n-1}, b_{n-1}, w_out_t, b_out_t, out_t)."""
    param_refs = refs[:-1]
    out_ref = refs[-1]

    h = x_ref[...]                                   # (tb, state) bf16
    # Hidden layers: Linear -> ReLU -> Dropout(identity, eval mode).
    for i in range(n_hidden):
        w = param_refs[2 * i][...]                   # bf16 (in_pad, out_pad)
        b = param_refs[2 * i + 1][...]               # f32  (1, out_pad)
        h = jnp.dot(h, w, preferred_element_type=jnp.float32) + b
        h = jnp.maximum(h, 0.0).astype(jnp.bfloat16)
    # Output layer, computed transposed: (act_pad, tb) with batch on lanes.
    w_out_t = param_refs[-2][...]                    # bf16 (act_pad, hid_pad)
    b_out_t = param_refs[-1][...]                    # f32  (act_pad, 1)
    out_t = lax.dot_general(
        w_out_t, h,
        dimension_numbers=(((1,), (1,)), ((), ())),  # contract hid with hid
        preferred_element_type=jnp.float32)          # (act_pad, tb)
    out_ref[...] = (out_t + b_out_t).astype(out_ref.dtype)


def prepare_qnetwork_params(params):
    """One-time packing of raw (W, b) pairs for the kernel.

    Hidden widths are zero-padded to 128 lanes (exact under ReLU), weights cast
    to bf16; the output layer is stored pre-transposed with the action dim
    padded only to 8 sublanes.  Call at init / after each parameter update,
    NOT inside the per-step forward.
    """
    n_hidden = len(params) - 1
    state_size = params[0][0].shape[0]
    action_size = params[-1][0].shape[1]

    flat = []
    in_pad = state_size                      # K of the first matmul: unpadded
    for w, b in params[:-1]:
        out_dim = w.shape[1]
        out_pad = _round_up(out_dim, _LANE)
        w_p = jnp.zeros((in_pad, out_pad), jnp.bfloat16)
        w_p = w_p.at[: w.shape[0], :out_dim].set(w.astype(jnp.bfloat16))
        b_p = jnp.zeros((1, out_pad), jnp.float32)
        b_p = b_p.at[:, :out_dim].set(b.reshape(1, -1).astype(jnp.float32))
        flat += [w_p, b_p]
        in_pad = out_pad

    # Output layer, stored transposed: (act_pad8, last_hidden_pad).
    w_out, b_out = params[-1]
    act_pad = _round_up(action_size, _SUBLANE)
    w_t = jnp.zeros((act_pad, in_pad), jnp.bfloat16)
    w_t = w_t.at[:action_size, : w_out.shape[0]].set(w_out.T.astype(jnp.bfloat16))
    b_t = jnp.zeros((act_pad, 1), jnp.float32)
    b_t = b_t.at[:action_size, 0].set(b_out.reshape(-1).astype(jnp.float32))
    flat += [w_t, b_t]

    return {
        "flat": tuple(flat),
        "n_hidden": n_hidden,
        "state_size": state_size,
        "action_size": action_size,
        "act_pad": act_pad,
    }


def qnetwork_forward(x, prepared, *, tile_b=2048):
    """x: [batch, state_size] f32/bf16; prepared: output of prepare_qnetwork_params.
    Returns [batch, action_size] f32.  Sweep tile_b in 1024-4096 for large batch.
    """
    flat = prepared["flat"]
    n_hidden = prepared["n_hidden"]
    state_size = prepared["state_size"]
    action_size = prepared["action_size"]
    act_pad = prepared["act_pad"]

    batch = x.shape[0]
    assert x.shape[1] == state_size, (x.shape, state_size)

    tb, batch_pad, n_steps = _choose_batch_tiling(batch, tile_b)

    x_in = x.astype(jnp.bfloat16)
    if batch_pad != batch:
        x_in = jnp.pad(x_in, ((0, batch_pad - batch), (0, 0)))

    in_specs = [pl.BlockSpec((tb, state_size), lambda i: (i, 0))]
    for arr in flat:
        # Resident parameters: same block every grid step -> DMA'd once.
        in_specs.append(pl.BlockSpec(arr.shape, lambda i: (0, 0)))
    # Transposed, lane-dense output: batch on the lane axis.
    out_specs = pl.BlockSpec((act_pad, tb), lambda i: (0, i))

    kernel = functools.partial(_mlp_kernel, n_hidden)

    out_t = pl.pallas_call(
        kernel,
        out_shape=jax.ShapeDtypeStruct((act_pad, batch_pad), jnp.float32),
        grid=(n_steps,),
        in_specs=in_specs,
        out_specs=out_specs,
        compiler_params=pltpu.CompilerParams(
            dimension_semantics=("parallel",)),
    )(x_in, *flat)

    return out_t[:action_size, :batch].T


def init_qnetwork_params(key, state_size, action_size, hidden_layers):
    """Deterministic init mimicking PyTorch's default Linear init."""
    sizes = [state_size] + list(hidden_layers) + [action_size]
    params = []
    for fan_in, fan_out in zip(sizes[:-1], sizes[1:]):
        key, kw, kb = jax.random.split(key, 3)
        bound = 1.0 / jnp.sqrt(jnp.float32(fan_in))
        w = jax.random.uniform(kw, (fan_in, fan_out), jnp.float32, -bound, bound)
        b = jax.random.uniform(kb, (1, fan_out), jnp.float32, -bound, bound)
        params.append((w, b))
    return params


def qnetwork_reference_f32(x, params):
    """Pure-JAX f32 reference of the forward (eval-mode dropout)."""
    h = x
    for w, b in params[:-1]:
        h = jnp.maximum(h @ w + b, 0.0)
    w, b = params[-1]
    return h @ w + b


def qnetwork_reference_bf16(x, params):
    """Precision-matched reference (bf16 inputs/weights, f32 accumulation)."""
    h = x.astype(jnp.bfloat16)
    for w, b in params[:-1]:
        h = jnp.dot(h, w.astype(jnp.bfloat16),
                    preferred_element_type=jnp.float32) + b
        h = jnp.maximum(h, 0.0).astype(jnp.bfloat16)
    w, b = params[-1]
    return jnp.dot(h, w.astype(jnp.bfloat16),
                   preferred_element_type=jnp.float32) + b


if __name__ == "__main__":
    state_size = 32
    action_size = 4
    hidden_layers = [64, 32]
    p_drop = 0.1  # unused at inference (dropout == identity)
    batch = 8

    key = jax.random.PRNGKey(0)
    key, kx = jax.random.split(key)
    x = jax.random.normal(kx, (batch, state_size), jnp.float32)

    params = init_qnetwork_params(key, state_size, action_size, hidden_layers)

    # One-time packing (at init / after each param update) — not per forward.
    prepared = prepare_qnetwork_params(params)

    # NOTE: in an RL loop, stack many states and call this once at large batch;
    # per-call overhead dominates at batch=8.
    out = qnetwork_forward(x, prepared)
    out = jax.block_until_ready(out)

    assert out.shape == (batch, action_size), out.shape

    # Tight check vs a precision-matched (bf16 weights, f32 acc) reference.
    ref_bf16 = qnetwork_reference_bf16(x, params)
    assert jnp.allclose(out, ref_bf16, atol=1e-3, rtol=1e-3), "mismatch vs bf16 reference"

    # Loose check vs the full-f32 semantic reference (bf16 param rounding).
    ref_f32 = qnetwork_reference_f32(x, params)
    assert jnp.allclose(out, ref_f32, atol=5e-2, rtol=5e-2), "mismatch vs f32 reference"

    print("KERNEL_OK")
</pallas_src>

<mosaic_0001>
module attributes {stable_mosaic.version = 11 : i64} {
  func.func @_mlp_kernel(%arg0: i32, %arg1: memref<8x32xbf16, #tpu.memory_space<vmem>>, %arg2: memref<32x128xbf16, #tpu.memory_space<vmem>>, %arg3: memref<1x128xf32, #tpu.memory_space<vmem>>, %arg4: memref<128x128xbf16, #tpu.memory_space<vmem>>, %arg5: memref<1x128xf32, #tpu.memory_space<vmem>>, %arg6: memref<8x128xbf16, #tpu.memory_space<vmem>>, %arg7: memref<8x1xf32, #tpu.memory_space<vmem>>, %arg8: memref<8x8xf32, #tpu.memory_space<vmem>>) attributes {dimension_semantics = [#tpu.dimension_semantics<parallel>], iteration_bounds = array<i64: 1>, scalar_prefetch = 0 : i64, scratch_operands = 0 : i64, tpu.core_type = #tpu.core_type<tc>, window_params = [{transform_indices = @transform_0, window_bounds = array<i64: 8, 32>}, {pipeline_mode = #tpu.pipeline_mode<synchronous>, transform_indices = @transform_1, window_bounds = array<i64: 32, 128>}, {pipeline_mode = #tpu.pipeline_mode<synchronous>, transform_indices = @transform_2, window_bounds = array<i64: 1, 128>}, {pipeline_mode = #tpu.pipeline_mode<synchronous>, transform_indices = @transform_3, window_bounds = array<i64: 128, 128>}, {pipeline_mode = #tpu.pipeline_mode<synchronous>, transform_indices = @transform_4, window_bounds = array<i64: 1, 128>}, {pipeline_mode = #tpu.pipeline_mode<synchronous>, transform_indices = @transform_5, window_bounds = array<i64: 8, 128>}, {pipeline_mode = #tpu.pipeline_mode<synchronous>, transform_indices = @transform_6, window_bounds = array<i64: 8, 1>}, {transform_indices = @transform_7, window_bounds = array<i64: 8, 8>}]} {
    %c0 = arith.constant 0 : index
    %c0_0 = arith.constant 0 : index
    %0 = vector.load %arg1[%c0, %c0_0] : memref<8x32xbf16, #tpu.memory_space<vmem>>, vector<8x32xbf16>
    %c0_1 = arith.constant 0 : index
    %c0_2 = arith.constant 0 : index
    %1 = vector.load %arg2[%c0_1, %c0_2] : memref<32x128xbf16, #tpu.memory_space<vmem>>, vector<32x128xbf16>
    %c0_3 = arith.constant 0 : index
    %c0_4 = arith.constant 0 : index
    %2 = vector.load %arg3[%c0_3, %c0_4] : memref<1x128xf32, #tpu.memory_space<vmem>>, vector<1x128xf32>
    %cst = arith.constant dense<0.000000e+00> : vector<8x128xf32>
    %3 = tpu.matmul %0, %1, %cst {dimension_numbers = #tpu.dot_dimension_numbers<[1], [0], [0], [1], [0, 0, 1, 1], [], []>} : vector<8x32xbf16>, vector<32x128xbf16>, vector<8x128xf32> -> vector<8x128xf32>
    %4 = vector.broadcast %2 : vector<1x128xf32> to vector<8x128xf32>
    %5 = arith.addf %3, %4 : vector<8x128xf32>
    %cst_5 = arith.constant 0.000000e+00 : f32
    %6 = vector.broadcast %cst_5 : f32 to vector<8x128xf32>
    %7 = arith.maximumf %5, %6 : vector<8x128xf32>
    %8 = arith.truncf %7 : vector<8x128xf32> to vector<8x128xbf16>
    %c0_6 = arith.constant 0 : index
    %c0_7 = arith.constant 0 : index
    %9 = vector.load %arg4[%c0_6, %c0_7] : memref<128x128xbf16, #tpu.memory_space<vmem>>, vector<128x128xbf16>
    %c0_8 = arith.constant 0 : index
    %c0_9 = arith.constant 0 : index
    %10 = vector.load %arg5[%c0_8, %c0_9] : memref<1x128xf32, #tpu.memory_space<vmem>>, vector<1x128xf32>
    %cst_10 = arith.constant dense<0.000000e+00> : vector<8x128xf32>
    %11 = tpu.matmul %8, %9, %cst_10 {dimension_numbers = #tpu.dot_dimension_numbers<[1], [0], [0], [1], [0, 0, 1, 1], [], []>} : vector<8x128xbf16>, vector<128x128xbf16>, vector<8x128xf32> -> vector<8x128xf32>
    %12 = vector.broadcast %10 : vector<1x128xf32> to vector<8x128xf32>
    %13 = arith.addf %11, %12 : vector<8x128xf32>
    %cst_11 = arith.constant 0.000000e+00 : f32
    %14 = vector.broadcast %cst_11 : f32 to vector<8x128xf32>
    %15 = arith.maximumf %13, %14 : vector<8x128xf32>
    %16 = arith.truncf %15 : vector<8x128xf32> to vector<8x128xbf16>
    %c0_12 = arith.constant 0 : index
    %c0_13 = arith.constant 0 : index
    %17 = vector.load %arg6[%c0_12, %c0_13] : memref<8x128xbf16, #tpu.memory_space<vmem>>, vector<8x128xbf16>
    %c0_14 = arith.constant 0 : index
    %c0_15 = arith.constant 0 : index
    %18 = vector.load %arg7[%c0_14, %c0_15] : memref<8x1xf32, #tpu.memory_space<vmem>>, vector<8x1xf32>
    %cst_16 = arith.constant dense<0.000000e+00> : vector<8x8xf32>
    %19 = tpu.matmul %17, %16, %cst_16 {dimension_numbers = #tpu.dot_dimension_numbers<[1], [1], [0], [0], [0, 0, 1, 0], [], []>} : vector<8x128xbf16>, vector<8x128xbf16>, vector<8x8xf32> -> vector<8x8xf32>
    %20 = vector.broadcast %18 : vector<8x1xf32> to vector<8x8xf32>
    %21 = arith.addf %19, %20 : vector<8x8xf32>
    %c0_17 = arith.constant 0 : index
    %c0_18 = arith.constant 0 : index
    %22 = vector.load %arg8[%c0_17, %c0_18] : memref<8x8xf32, #tpu.memory_space<vmem>>, vector<8x8xf32>
    tpu.vector_store %arg8[%c0_17, %c0_18], %21 {strides = array<i32>} : memref<8x8xf32, #tpu.memory_space<vmem>>, vector<8x8xf32>,
    return
  }
  func.func @transform_0(%arg0: i32) -> (i32, i32) {
    %c0_i32 = arith.constant 0 : i32
    %c0_i32_0 = arith.constant 0 : i32
    return %arg0, %c0_i32 : i32, i32
  }
  func.func @transform_1(%arg0: i32) -> (i32, i32) {
    %c0_i32 = arith.constant 0 : i32
    %c0_i32_0 = arith.constant 0 : i32
    %c0_i32_1 = arith.constant 0 : i32
    return %c0_i32, %c0_i32_0 : i32, i32
  }
  func.func @transform_2(%arg0: i32) -> (i32, i32) {
    %c0_i32 = arith.constant 0 : i32
    %c0_i32_0 = arith.constant 0 : i32
    %c0_i32_1 = arith.constant 0 : i32
    return %c0_i32, %c0_i32_0 : i32, i32
  }
  func.func @transform_3(%arg0: i32) -> (i32, i32) {
    %c0_i32 = arith.constant 0 : i32
    %c0_i32_0 = arith.constant 0 : i32
    %c0_i32_1 = arith.constant 0 : i32
    return %c0_i32, %c0_i32_0 : i32, i32
  }
  func.func @transform_4(%arg0: i32) -> (i32, i32) {
    %c0_i32 = arith.constant 0 : i32
    %c0_i32_0 = arith.constant 0 : i32
    %c0_i32_1 = arith.constant 0 : i32
    return %c0_i32, %c0_i32_0 : i32, i32
  }
  func.func @transform_5(%arg0: i32) -> (i32, i32) {
    %c0_i32 = arith.constant 0 : i32
    %c0_i32_0 = arith.constant 0 : i32
    %c0_i32_1 = arith.constant 0 : i32
    return %c0_i32, %c0_i32_0 : i32, i32
  }
  func.func @transform_6(%arg0: i32) -> (i32, i32) {
    %c0_i32 = arith.constant 0 : i32
    %c0_i32_0 = arith.constant 0 : i32
    %c0_i32_1 = arith.constant 0 : i32
    return %c0_i32, %c0_i32_0 : i32, i32
  }
  func.func @transform_7(%arg0: i32) -> (i32, i32) {
    %c0_i32 = arith.constant 0 : i32
    %c0_i32_0 = arith.constant 0 : i32
    return %c0_i32, %arg0 : i32, i32
  }
}

</mosaic_0001>

<bundles_post_ra>
// kernel: tpu_custom_call.1
= control target key start
LH: loop header
LB: loop body
LE: loop exit
PB: predicated region body
PF: predicated region fallthrough
CT: control target
= control target key end

     0   :  { %12 = vsyncpa [#allocation3], 0  ;;  %s525_s0 = inlined_call_operand.vmem [shape: bf16[8,32], index: 0, kind: input, shape index: {}]   ;;  %s526_s1 = inlined_call_operand.hbm [shape: bf16[32,128], index: 1, kind: input, shape index: {}]   ;;  %s527_s2 = inlined_call_operand.vmem [shape: f32[1,128], index: 2, kind: input, shape index: {}]   ;;  %s528_s3 = inlined_call_operand.hbm [shape: bf16[128,128], index: 3, kind: input, shape index: {}]   ;;  %s529_s4 = inlined_call_operand.vmem [shape: f32[1,128], index: 4, kind: input, shape index: {}]   ;;  %s530_s5 = inlined_call_operand.vmem [shape: bf16[8,128], index: 5, kind: input, shape index: {}]   ;;  %s531_s6 = inlined_call_operand.vmem [shape: f32[8,1], index: 6, kind: input, shape index: {}]   ;;  %s532_s7 = inlined_call_operand.hbm [shape: f32[8,8], index: 7, kind: output, shape index: {}]  }
   0x1   :  { %13 = vsyncpa [#allocation6], 0 }
   0x2   :  { %14 = vsyncpa [#allocation4], 0  ;;  %s450_s24 = smov [#allocation2]  }
   0x3   :  { %s22_s25 = sshll.u32 %s450_s24, 4  ;;  %s23_s25 = int_to_ptr.vmem [resolvable:$true] %s22_s25 }
   0x4   :  { %s392_s26 = scalar_lea.vmem %s23_s25, 256  ;;  %p397_p1 = scmp.lt.s32.totalorder %s23_s25, %s23_s25 }
   0x5   :  { %p393_p0 = scmp.ne.s32.totalorder %s23_s25, %s392_s26  ;;  %p398_p2 = scmp.lt.s32.totalorder %s392_s26, %s392_s26 }
   0x7   :  { %p399_p3 = por %p398_p2, %p397_p1 }
   0x9   :  { %p400_p4 = pnand %p399_p3, %p393_p0 }
   0xb   :  { %403 = shalt.err (!%p400_p4)
}
   0xc   :  { %s451_s27 = smov 64   ;;  %s452_s28 = smov 4  }
   0xd   :  { %28 = dma.hbm_to_vmem [thread:$0]  %s526_s1, 256, %s23_s25, [#allocation3], %s451_s27, %s451_s27, %s452_s28  }
   0xe   :  { %s453_s8 = smov [#allocation5]  }
   0xf   :  { %s36_s9 = sshll.u32 %s453_s8, 4  ;;  %s37_s9 = int_to_ptr.vmem [resolvable:$true] %s36_s9 }
  0x10   :  { %s412_s10 = scalar_lea.vmem %s37_s9, 1024  ;;  %p417_p6 = scmp.lt.s32.totalorder %s37_s9, %s37_s9 }
  0x11   :  { %p413_p5 = scmp.ne.s32.totalorder %s37_s9, %s412_s10  ;;  %p418_p7 = scmp.lt.s32.totalorder %s412_s10, %s412_s10 }
  0x13   :  { %p419_p8 = por %p418_p7, %p417_p6 }
  0x15   :  { %p420_p9 = pnand %p419_p8, %p413_p5 }
  0x17   :  { %423 = shalt.err (!%p420_p9)
}
  0x18   :  { %42 = dma.hbm_to_vmem [thread:$0]  %s528_s3, 1024, %s37_s9, [#allocation6], %s451_s27, %s451_s27, %s452_s28  }
  0x19   :  { %444 = dma.done.wait [#allocation3], 256  }
  0x1a   :  { %445 = vsyncadd [#allocation3], 4294967040 }
  0x1b   :  { %446 = dma.done.wait [#allocation6], 1024  }
  0x1c   :  { %447 = vsyncadd [#allocation6], 4294966272  ;;  %v454_v0 = vmov 0.0   ;;  %vm455_vm0 = vmmov 0   ;;  %v374_v1 = vld [vmem:[#allocation2 + $0x8] sm:$0xff]   ;;  %v375_v2 = vld [vmem:[#allocation2] sm:$0xff]  }
  0x1d   :  { %331 = vmatprep.subr.bf16.mxu0 %v454_v0  ;;  %335 = vmatprep.mubr.msk.bf16.mxu0 %vm455_vm0, %v454_v0  ;;  %v376_v3 = vld [vmem:[#allocation5 + $0x38] sm:$0xff]   ;;  %vm80_vm1 = vcmask 261120   ;;  %v377_v4 = vld [vmem:[#allocation5 + $0x30] sm:$0xff]   ;;  %v378_v6 = vld [vmem:[#allocation5 + $0x28] sm:$0xff]   ;;  %v456_v21 = vmov 0   ;;  %vm286_vm2 = vcmask 64512  }
  0x1e   :  { %339 = vmatprep.subr.bf16.mxu1 %v454_v0  ;;  %355 = vmatprep.mubr.msk.bf16.mxu1 %vm455_vm0, %v454_v0  ;;  %v56_v5 = vld [vmem:[%s525_s0] sm:$0xf]  ;;  %v379_v7 = vld [vmem:[#allocation5 + $0x20] sm:$0xff]   ;;  %v380_v8 = vld [vmem:[#allocation5 + $0x18] sm:$0xff]  }
  0x1f   :  { %332 = vmatpush3.bf16.msra.mxu0 %v374_v1  ;;  %340 = vmatpush3.bf16.msra.mxu1 %v376_v3  ;;  %v381_v9 = vld [vmem:[#allocation5 + $0x10] sm:$0xff]   ;;  %v382_v10 = vld [vmem:[#allocation5 + $0x8] sm:$0xff]   ;;  %v383_v11 = vld [vmem:[#allocation5] sm:$0xff]  }
  0x20   :  { %333 = vmatprep.subr.bf16.mxu0 %v454_v0  ;;  %341 = vmatprep.subr.bf16.mxu1 %v454_v0  ;;  %v304_v12 = vld [vmem:[%s527_s2] ss:$0 sm:$0xff] }
  0x21   :  { %v240_v20 = vld [vmem:[%s531_s6] sm:$0xff]  ;;  %373 = vset.pattern.permute.xlu0 %v456_v21  ;;  %s457_s6 = smov [#allocation7]  }
  0x22   :  { %243 = vperm.xlu0 %373, %v240_v20   ;;  %v308_v22 = vld [vmem:[%s529_s4] ss:$0 sm:$0xff]  ;;  %s294_s19 = sshll.u32 %s457_s6, 4  ;;  %s295_s19 = int_to_ptr.vmem [resolvable:$true] %s294_s19 }
  0x23   :  { %334 = vmatpush3.bf16.msra.mxu0 %v375_v2  ;;  %342 = vmatpush3.bf16.msra.mxu1 %v377_v4  ;;  %v239_v30 = vld [vmem:[%s530_s5] sm:$0xf]  ;;  %s424_s4 = scalar_lea.vmem %s295_s19, 128  ;;  %p429_p11 = scmp.lt.s32.totalorder %s295_s19, %s295_s19 }
  0x24   :  { %359 = vmatprep.subr.bf16.mxu0 %v454_v0  ;;  %343 = vmatprep.subr.bf16.mxu1 %v454_v0  ;;  %p425_p10 = scmp.ne.s32.totalorder %s295_s19, %s424_s4  ;;  %p430_p12 = scmp.lt.s32.totalorder %s424_s4, %s424_s4 }
  0x26   :  { %336 = vmatmul.mubr.msk.bf16.vlgmr.msra.gmra.mxu0 %vm80_vm1, %v56_v5  ;;  %p431_p13 = por %p430_p12, %p429_p11 }
  0x27   :  { %361 = vmatprep.mubr.msk.bf16.mxu0 %vm455_vm0, %v454_v0  ;;  %344 = vmatpush3.bf16.msra.mxu1 %v378_v6 }
  0x28   :  { %345 = vmatprep.subr.bf16.mxu1 %v454_v0  ;;  %p432_p0 = pnand %p431_p13, %p425_p10 }
  0x2b   :  { %346 = vmatpush3.bf16.msra.mxu1 %v379_v7 }
  0x2c   :  { %347 = vmatprep.subr.bf16.mxu1 %v454_v0 }
  0x2f   :  { %348 = vmatpush3.bf16.msra.mxu1 %v380_v8 }
  0x30   :  { %349 = vmatprep.subr.bf16.mxu1 %v454_v0 }
  0x33   :  { %350 = vmatpush3.bf16.msra.mxu1 %v381_v9 }
  0x34   :  { %351 = vmatprep.subr.bf16.mxu1 %v454_v0 }
  0x37   :  { %352 = vmatpush3.bf16.msra.mxu1 %v382_v10 }
  0x38   :  { %353 = vmatprep.subr.bf16.mxu1 %v454_v0 }
  0x3b   :  { %354 = vmatpush3.bf16.msra.mxu1 %v383_v11 }
  0x9d   :  { %v244_v31 = vpop.permute.xlu0 %243 }
  0xe6   :  { %v118_v13 = vpop.f32.mrf.mxu0 }
  0xe7   :  { %v119_v14 = vadd.f32 %v304_v12, %v118_v13 }
  0xe8   :  { %v337_v15 = vpop.f32.mrf.mxu0 }
  0xe9   :  { %v124_v16 = vmax.f32 %v119_v14, 0.0 }
  0xea   :  { %v121_v17 = vpop.f32.mrf.mxu0 }
  0xeb   :  { %v125_v18 = vpack.c.bf16 %v124_v16, %v124_v16 }
  0xec   :  { %v338_v19 = vpop.f32.mrf.mxu0 }
  0xed   :  { %356 = vmatmul.mubr.bf16.vlgmr.msra.gmra.mxu1 %v125_v18 }
 0x1ad   :  { %v231_v23 = vpop.f32.mrf.mxu1 }
 0x1ae   :  { %v232_v24 = vadd.f32 %v308_v22, %v231_v23 }
 0x1af   :  { %v357_v25 = vpop.f32.mrf.mxu1 }
 0x1b0   :  { %v237_v26 = vmax.f32 %v232_v24, 0.0 }
 0x1b1   :  { %v234_v27 = vpop.f32.mrf.mxu1 }
 0x1b2   :  { %v238_v28 = vpack.c.bf16 %v237_v26, %v237_v26 }
 0x1b3   :  { %v358_v29 = vpop.f32.mrf.mxu1 }
 0x1b4   :  { %360 = vmatpush3.bf16.xpose.msra.mxu0 %v238_v28 }
 0x1bb   :  { %362 = vmatmul.mubr.bf16.vlgmr.msra.gmra.mxu0 %v239_v30 }
 0x27b   :  { %v280_v32 = vpop.f32.mrf.mxu0 }
 0x27c   :  { %v281_v33 = vadd.f32 %v280_v32, %v244_v31 }
 0x27d   :  { %v363_v34 = vpop.f32.mrf.mxu0 }
 0x27e   :  { %287 = vst.msk [vmem:[#allocation7] sm:$0xff] %vm286_vm2, %v281_v33 }
 0x27f   :  { %v283_v35 = vpop.f32.mrf.mxu0 }
 0x280   :  { %435 = shalt.err (!%p432_p0)
}
 0x281   :  { %297 = dma.vmem_to_hbm [thread:$0]  %s295_s19, 128, %s532_s7, [#allocation4]   ;;  %v364_v36 = vpop.f32.mrf.mxu0 }
 0x282   :  { %448 = dma.done.wait [#allocation4], 128  }
 0x283   :  { %449 = vsyncadd [#allocation4], 4294967168 }
 0x284   :  { %301 = vsyncpa [#allocation3], 1 }
 0x285   :  { %302 = vsyncpa [#allocation6], 1 }
 0x286   :  { %303 = vsyncpa [#allocation4], 1 }

</bundles_post_ra>
